<compile_context>
chip_gen: v5e
topology: v5e:2x2
jax: 0.10.0
libtpu: 0.0.40
codegen_flags: <defaults>
</compile_context>

<pallas_src>
import functools

import jax
import jax.numpy as jnp
from jax import lax
from jax.experimental import pallas as pl
from jax.experimental.pallas import tpu as pltpu

_LANES = 128
_MAX_TILE_ROWS = 2048   # ~1 MiB f32 per block; multiple of 32 (int8 packing)

_GOLDEN = -1640531527   # 0x9E3779B9 as int32
_MIX1 = -2048144789     # 0x85EBCA6B as int32
_MIX2 = -1028477387     # 0xC2B2AE35 as int32


def _shr_logical(x, k):
    """Logical right shift for int32 arrays (arithmetic shift + mask)."""
    return (x >> k) & jnp.int32((1 << (32 - k)) - 1)


def _fmix32(h):
    """murmur3 32-bit finalizer on int32 (wrap-around multiply semantics)."""
    h = h ^ _shr_logical(h, 16)
    h = h * jnp.int32(_MIX1)
    h = h ^ _shr_logical(h, 13)
    h = h * jnp.int32(_MIX2)
    h = h ^ _shr_logical(h, 16)
    return h


def _random_drop_kernel(threshold, value, tile_rows, seed_ref, x_ref, o_ref):
    i = pl.program_id(0)
    shape = x_ref.shape

    # Global element index for every lane of this block.
    row = lax.broadcasted_iota(jnp.int32, shape, 0) + i * tile_rows
    col = lax.broadcasted_iota(jnp.int32, shape, 1)
    idx = row * jnp.int32(_LANES) + col

    # Counter-based hash of (index, seed): independent per element / per step.
    h = idx * jnp.int32(_GOLDEN) + seed_ref[0]
    h = _fmix32(h)

    # Low 24 bits are uniform in [0, 2^24); integer threshold compare.
    bits = h & jnp.int32(0x00FFFFFF)
    drop = bits < jnp.int32(threshold)

    fill = jnp.asarray(value, dtype=o_ref.dtype)
    o_ref[...] = jnp.where(drop, fill, x_ref[...])


def random_drop(x, p, value=0, seed=0):
    """Pallas TPU implementation of RandomDrop.forward."""
    orig_shape = x.shape
    orig_dtype = x.dtype
    n = x.size
    if n == 0:
        return x

    # Integer drop threshold with 24-bit resolution.
    threshold = int(round(float(p) * (1 << 24)))
    threshold = max(0, min(threshold, 1 << 24))

    # Lane-dense slab; pad only if numel is not already a multiple of 128.
    n_pad = ((n + _LANES - 1) // _LANES) * _LANES
    flat = jnp.reshape(x, (n,))
    if n_pad != n:
        flat = jnp.pad(flat, (0, n_pad - n))
    rows = n_pad // _LANES
    slab = jnp.reshape(flat, (rows, _LANES))

    # Large streaming blocks; a single full-array block for small inputs
    # (block == full dim is always a legal tile, no (8,128) issue).
    tile_rows = rows if rows <= _MAX_TILE_ROWS else _MAX_TILE_ROWS
    grid = (pl.cdiv(rows, tile_rows),)

    seed_arr = jnp.asarray([seed], dtype=jnp.int32)
    kernel = functools.partial(_random_drop_kernel, threshold, value, tile_rows)
    itemsize = jnp.dtype(orig_dtype).itemsize

    out = pl.pallas_call(
        kernel,
        out_shape=jax.ShapeDtypeStruct((rows, _LANES), orig_dtype),
        grid_spec=pltpu.PrefetchScalarGridSpec(
            num_scalar_prefetch=1,
            grid=grid,
            in_specs=[
                pl.BlockSpec((tile_rows, _LANES), lambda i, seed: (i, 0)),
            ],
            out_specs=pl.BlockSpec((tile_rows, _LANES), lambda i, seed: (i, 0)),
        ),
        compiler_params=pltpu.CompilerParams(
            # Grid steps are fully independent (stateless hash PRNG), so the
            # axis may shard across TensorCores on v7x.
            dimension_semantics=("parallel",),
        ),
        cost_estimate=pl.CostEstimate(
            flops=0, transcendentals=0, bytes_accessed=2 * n_pad * itemsize),
    )(seed_arr, slab)

    out_flat = jnp.reshape(out, (n_pad,))
    if n_pad != n:
        out_flat = out_flat[:n]
    return jnp.reshape(out_flat, orig_shape)


if __name__ == "__main__":
    key = jax.random.PRNGKey(0)
    x = jax.random.normal(key, (2, 4, 16, 16), dtype=jnp.float32)

    p = 0.3
    value = 0.0

    y = random_drop(x, p=p, value=value, seed=1234)
    y = jax.block_until_ready(y)

    # Sanity: shape/dtype preserved, kept elements identical, dropped elements
    # equal `value`, drop fraction roughly p.
    assert y.shape == x.shape and y.dtype == x.dtype
    dropped = (y == value) & (x != value)
    kept = ~dropped
    assert bool(jnp.all(jnp.where(kept, y == x, True)))
    frac = float(jnp.mean(dropped.astype(jnp.float32)))
    assert 0.05 < frac < 0.6, f"unexpected drop fraction {frac}"

    # p = 0 must be the identity.
    y0 = random_drop(x, p=0.0, value=value, seed=7)
    assert bool(jnp.all(y0 == x))

    print("KERNEL_OK")
</pallas_src>

<mosaic_0001>
module attributes {stable_mosaic.version = 11 : i64} {
  func.func @_random_drop_kernel(%arg0: i32, %arg1: memref<1xi32, #tpu.memory_space<smem>>, %arg2: memref<16x128xf32, #tpu.memory_space<vmem>>, %arg3: memref<16x128xf32, #tpu.memory_space<vmem>>) attributes {dimension_semantics = [#tpu.dimension_semantics<parallel>], iteration_bounds = array<i64: 1>, scalar_prefetch = 1 : i64, scratch_operands = 0 : i64, tpu.core_type = #tpu.core_type<tc>, window_params = [{transform_indices = @transform_0, window_bounds = array<i64: 16, 128>}, {transform_indices = @transform_1, window_bounds = array<i64: 16, 128>}]} {
    %0 = tpu.iota {dimensions = array<i32: 0>} : vector<16x128xi32>
    %c16_i32 = arith.constant 16 : i32
    %1 = arith.muli %arg0, %c16_i32 : i32
    %2 = vector.broadcast %1 : i32 to vector<16x128xi32>
    %3 = arith.addi %0, %2 : vector<16x128xi32>
    %4 = tpu.iota {dimensions = array<i32: 1>} : vector<16x128xi32>
    %c128_i32 = arith.constant 128 : i32
    %5 = vector.broadcast %c128_i32 : i32 to vector<16x128xi32>
    %6 = arith.muli %3, %5 : vector<16x128xi32>
    %7 = arith.addi %6, %4 : vector<16x128xi32>
    %c-1640531527_i32 = arith.constant -1640531527 : i32
    %8 = vector.broadcast %c-1640531527_i32 : i32 to vector<16x128xi32>
    %9 = arith.muli %7, %8 : vector<16x128xi32>
    %c0 = arith.constant 0 : index
    %10 = memref.load %arg1[%c0] : memref<1xi32, #tpu.memory_space<smem>>
    %11 = vector.broadcast %10 : i32 to vector<16x128xi32>
    %12 = arith.addi %9, %11 : vector<16x128xi32>
    %c16_i32_0 = arith.constant 16 : i32
    %13 = vector.broadcast %c16_i32_0 : i32 to vector<16x128xi32>
    %14 = arith.shrsi %12, %13 : vector<16x128xi32>
    %c65535_i32 = arith.constant 65535 : i32
    %15 = vector.broadcast %c65535_i32 : i32 to vector<16x128xi32>
    %16 = arith.andi %14, %15 : vector<16x128xi32>
    %17 = arith.xori %12, %16 : vector<16x128xi32>
    %c-2048144789_i32 = arith.constant -2048144789 : i32
    %18 = vector.broadcast %c-2048144789_i32 : i32 to vector<16x128xi32>
    %19 = arith.muli %17, %18 : vector<16x128xi32>
    %c13_i32 = arith.constant 13 : i32
    %20 = vector.broadcast %c13_i32 : i32 to vector<16x128xi32>
    %21 = arith.shrsi %19, %20 : vector<16x128xi32>
    %c524287_i32 = arith.constant 524287 : i32
    %22 = vector.broadcast %c524287_i32 : i32 to vector<16x128xi32>
    %23 = arith.andi %21, %22 : vector<16x128xi32>
    %24 = arith.xori %19, %23 : vector<16x128xi32>
    %c-1028477387_i32 = arith.constant -1028477387 : i32
    %25 = vector.broadcast %c-1028477387_i32 : i32 to vector<16x128xi32>
    %26 = arith.muli %24, %25 : vector<16x128xi32>
    %c16_i32_1 = arith.constant 16 : i32
    %27 = vector.broadcast %c16_i32_1 : i32 to vector<16x128xi32>
    %28 = arith.shrsi %26, %27 : vector<16x128xi32>
    %c65535_i32_2 = arith.constant 65535 : i32
    %29 = vector.broadcast %c65535_i32_2 : i32 to vector<16x128xi32>
    %30 = arith.andi %28, %29 : vector<16x128xi32>
    %31 = arith.xori %26, %30 : vector<16x128xi32>
    %c16777215_i32 = arith.constant 16777215 : i32
    %32 = vector.broadcast %c16777215_i32 : i32 to vector<16x128xi32>
    %33 = arith.andi %31, %32 : vector<16x128xi32>
    %c5033165_i32 = arith.constant 5033165 : i32
    %34 = vector.broadcast %c5033165_i32 : i32 to vector<16x128xi32>
    %35 = arith.cmpi slt, %33, %34 : vector<16x128xi32>
    %c0_3 = arith.constant 0 : index
    %c0_4 = arith.constant 0 : index
    %36 = vector.load %arg2[%c0_3, %c0_4] : memref<16x128xf32, #tpu.memory_space<vmem>>, vector<16x128xf32>
    %cst = arith.constant 0.000000e+00 : f32
    %37 = vector.broadcast %cst : f32 to vector<16x128xf32>
    %38 = arith.select %35, %37, %36 : vector<16x128xi1>, vector<16x128xf32>
    %c0_5 = arith.constant 0 : index
    %c0_6 = arith.constant 0 : index
    %39 = vector.load %arg3[%c0_5, %c0_6] : memref<16x128xf32, #tpu.memory_space<vmem>>, vector<16x128xf32>
    tpu.vector_store %arg3[%c0_5, %c0_6], %38 {strides = array<i32>} : memref<16x128xf32, #tpu.memory_space<vmem>>, vector<16x128xf32>,
    return
  }
  func.func @transform_0(%arg0: i32, %arg1: memref<1xi32, #tpu.memory_space<smem>>) -> (i32, i32) {
    %c0_i32 = arith.constant 0 : i32
    %c0_i32_0 = arith.constant 0 : i32
    return %arg0, %c0_i32 : i32, i32
  }
  func.func @transform_1(%arg0: i32, %arg1: memref<1xi32, #tpu.memory_space<smem>>) -> (i32, i32) {
    %c0_i32 = arith.constant 0 : i32
    %c0_i32_0 = arith.constant 0 : i32
    return %arg0, %c0_i32 : i32, i32
  }
}

</mosaic_0001>

<bundles_post_ra>
// kernel: tpu_custom_call.1
= control target key start
LH: loop header
LB: loop body
LE: loop exit
PB: predicated region body
PF: predicated region fallthrough
CT: control target
= control target key end

     0   :  { %8 = vsyncpa [#allocation5], 0  ;;  %s193_s0 = inlined_call_operand.<no memory space> [shape: s32[1], index: 0, kind: input, shape index: {}]   ;;  %s194_s1 = inlined_call_operand.hbm [shape: f32[16,128], index: 1, kind: input, shape index: {}]   ;;  %s195_s2 = inlined_call_operand.hbm [shape: f32[16,128], index: 2, kind: output, shape index: {}]  }
   0x1   :  { %9 = vsyncpa [#allocation6], 0  ;;  %s14_s11 = sshll.u32 %s194_s1, 4  ;;  %s159_s12 = smov [#allocation4]   ;;  %s15_s11 = int_to_ptr.hbm [resolvable:$true] %s14_s11 }
   0x2   :  { %s16_s13 = sshll.u32 %s159_s12, 4  ;;  %s160_s14 = smov 128   ;;  %s17_s13 = int_to_ptr.vmem [resolvable:$true] %s16_s13 }
   0x3   :  { %s161_s15 = smov 8  }
   0x4   :  { %22 = dma.hbm_to_vmem [thread:$0]  %s15_s11, 256, %s17_s13, [#allocation5], %s160_s14, %s160_s14, %s161_s15  }
   0x5   :  { %155 = dma.done.wait [#allocation5], 256  }
   0x6   :  { %156 = vsyncadd [#allocation5], 4294967040  ;;  %v27_v0 = vlaneseq  ;;  %v43_v7 = vstv %s193_s0  ;;  %v72_v29 = vld [vmem:[#allocation4] sm:$0xff]  ;;  %s162_s0 = smov [#allocation7]   ;;  %s84_s20 = sshll.u32 %s195_s2, 4  ;;  %v73_v32 = vld [vmem:[#allocation4 + $0x8] sm:$0xff]  ;;  %s85_s20 = int_to_ptr.hbm [resolvable:$true] %s84_s20 }
   0x7   :  { %s82_s17 = sshll.u32 %s162_s0, 4  ;;  %s83_s17 = int_to_ptr.vmem [resolvable:$true] %s82_s17 }
   0x8   :  { %v28_v1 = vshrl.u32 %v27_v0, 7  ;;  %v35_v2 = vand.u32 127, %v27_v0 }
   0xa   :  { %v36_v3 = vmul.u32 128, %v28_v1  ;;  %v29_v4 = vadd.s32 8, %v28_v1 }
   0xc   :  { %v38_v5 = vadd.s32 %v36_v3, %v35_v2  ;;  %v37_v6 = vmul.u32 128, %v29_v4 }
   0xe   :  { %v40_v8 = vmul.u32 2654435769, %v38_v5  ;;  %v39_v9 = vadd.s32 %v37_v6, %v35_v2 }
  0x10   :  { %v44_v10 = vadd.s32 %v43_v7, %v40_v8  ;;  %v41_v11 = vmul.u32 2654435769, %v39_v9 }
  0x12   :  { %v97_v12 = vshrl.u32 %v44_v10, 16  ;;  %v45_v13 = vadd.s32 %v43_v7, %v41_v11 }
  0x14   :  { %v50_v14 = vxor.u32 %v97_v12, %v44_v10  ;;  %v98_v15 = vshrl.u32 %v45_v13, 16 }
  0x16   :  { %v52_v16 = vmul.u32 2246822507, %v50_v14  ;;  %v51_v17 = vxor.u32 %v98_v15, %v45_v13 }
  0x18   :  { %v99_v18 = vshrl.u32 %v52_v16, 13  ;;  %v53_v19 = vmul.u32 2246822507, %v51_v17 }
  0x1a   :  { %v58_v20 = vxor.u32 %v99_v18, %v52_v16  ;;  %v100_v21 = vshrl.u32 %v53_v19, 13 }
  0x1c   :  { %v60_v22 = vmul.u32 3266489909, %v58_v20  ;;  %v59_v23 = vxor.u32 %v100_v21, %v53_v19 }
  0x1e   :  { %v101_v24 = vshrl.u32 %v60_v22, 16  ;;  %v61_v25 = vmul.u32 3266489909, %v59_v23 }
  0x20   :  { %v66_v26 = vxor.u32 %v101_v24, %v60_v22  ;;  %v102_v27 = vshrl.u32 %v61_v25, 16 }
  0x22   :  { %v68_v28 = vand.u32 16777215, %v66_v26  ;;  %v67_v30 = vxor.u32 %v102_v27, %v61_v25 }
  0x24   :  { %vm70_vm0 = vcmp.lt.s32.totalorder %v68_v28, 5033165  ;;  %v69_v31 = vand.u32 16777215, %v67_v30 }
  0x25   :  { %v74_v33 = vsel %vm70_vm0, 0.0, %v72_v29 }
  0x26   :  { %76 = vst [vmem:[#allocation7] sm:$0xff] %v74_v33  ;;  %vm71_vm1 = vcmp.lt.s32.totalorder %v69_v31, 5033165 }
  0x27   :  { %v75_v34 = vsel %vm71_vm1, 0.0, %v73_v32 }
  0x28   :  { %77 = vst [vmem:[#allocation7 + $0x8] sm:$0xff] %v75_v34 }
  0x29   :  { %90 = dma.vmem_to_hbm [thread:$0]  %s83_s17, 256, %s85_s20, [#allocation6], %s160_s14, %s160_s14, %s161_s15  }
  0x2a   :  { %157 = dma.done.wait [#allocation6], 256  }
  0x2b   :  { %158 = vsyncadd [#allocation6], 4294967040 }
  0x2c   :  { %95 = vsyncpa [#allocation5], 1 }
  0x2d   :  { %96 = vsyncpa [#allocation6], 1 }

</bundles_post_ra>
